<compile_context>
chip_gen: v5e
topology: v5e:2x2
jax: 0.10.0
libtpu: 0.0.40
codegen_flags: <defaults>
</compile_context>

<pallas_src>
import jax
import jax.numpy as jnp
import numpy as np
from jax.experimental import pallas as pl
from jax.experimental.pallas import tpu as pltpu

BN_EPS = 1e-5


def mlp_kernel(x_ref, w0_ref, b0_ref, wh_ref, bh_ref, wout_ref, bout_ref, out_ref):
    # First Linear + ReLU  (bf16 MXU matmul, f32 accumulation, f32 VPU elementwise)
    h = jnp.dot(x_ref[...], w0_ref[...], preferred_element_type=jnp.float32)
    h = jnp.maximum(h + b0_ref[...], 0.0)

    # Hidden blocks: Linear (eval-BN pre-folded into W/b on host) + ReLU.
    # Dropout(0.5) after blocks 0 and 2 is identity in eval mode.
    n_hidden = wh_ref.shape[0]
    for i in range(n_hidden):  # statically unrolled (small, fixed trip count)
        h = jnp.dot(h.astype(wh_ref.dtype), wh_ref[i],
                    preferred_element_type=jnp.float32) + bh_ref[i]
        h = jnp.maximum(h, 0.0)

    # Output Linear (lane-dense padded width, sliced in the wrapper)
    out_ref[...] = (jnp.dot(h.astype(wout_ref.dtype), wout_ref[...],
                            preferred_element_type=jnp.float32) + bout_ref[...])


def simple_mlp_forward(x, prep, *, tile_b=None):
    """x: (B, IN) float32; prep: output of prepare_params(). Returns (B, num_classes) f32."""
    B, IN = x.shape
    H = prep["w0"].shape[1]
    NCp = prep["wout"].shape[1]          # lane-padded classifier width (multiple of 128)
    NL = prep["wh"].shape[0]
    NC = prep["nc"]

    if tile_b is None:
        tile_b = min(B, 128)             # >=2 grid steps for B>=256 -> both v7x TCs busy
    assert B % tile_b == 0, "batch must be a multiple of tile_b"
    assert tile_b == B or tile_b % 8 == 0, "tile_b must be a multiple of 8"

    x_bf = x.astype(jnp.bfloat16)        # halve input DMA; MXU-native dtype

    def full(shape):
        # whole-array block, reused (same block index) at every grid step
        return pl.BlockSpec(shape, lambda i, _n=len(shape): (0,) * _n)

    # Explicit VMEM budget (matters on v7x's 64 MiB; double-buffered operands).
    w_bytes = 2 * 2 * (IN * H + NL * H * H + H * NCp)         # bf16 weights x2 buffers
    b_bytes = 2 * 4 * (H + NL * H + NCp)                      # f32 biases x2 buffers
    io_bytes = 2 * (tile_b * IN * 2 + tile_b * NCp * 4)       # x / out tiles x2 buffers
    vmem_limit = int(min(max(w_bytes + b_bytes + io_bytes + (8 << 20), 32 << 20), 100 << 20))

    flops = 2 * B * (IN * H + NL * H * H + H * NCp)
    bytes_accessed = (B * IN * 2
                      + 2 * (IN * H + NL * H * H + H * NCp)
                      + 4 * (H + NL * H + NCp)
                      + B * NCp * 4)

    out_full = pl.pallas_call(
        mlp_kernel,
        out_shape=jax.ShapeDtypeStruct((B, NCp), jnp.float32),
        grid=(B // tile_b,),
        in_specs=[
            pl.BlockSpec((tile_b, IN), lambda i: (i, 0)),  # x: tiled over batch
            full((IN, H)),        # w0            (bf16)
            full((1, H)),         # b0            (f32)
            full((NL, H, H)),     # hidden weights, BN folded (bf16)
            full((NL, 1, H)),     # hidden biases, BN folded  (f32)
            full((H, NCp)),       # wout, zero-padded to 128 lanes (bf16)
            full((1, NCp)),       # bout, zero-padded               (f32)
        ],
        out_specs=pl.BlockSpec((tile_b, NCp), lambda i: (i, 0)),
        compiler_params=pltpu.CompilerParams(
            dimension_semantics=("parallel",),
            vmem_limit_bytes=vmem_limit),
        cost_estimate=pl.CostEstimate(flops=flops, transcendentals=0,
                                      bytes_accessed=bytes_accessed),
    )(x_bf, prep["w0"], prep["b0"], prep["wh"], prep["bh"], prep["wout"], prep["bout"])

    return out_full[:, :NC]


def prepare_params(p):
    """Host-side prep: fold eval-BN into weights, pad classifier to 128 lanes, cast weights to bf16."""
    s = p["gamma"] * jax.lax.rsqrt(p["var"] + BN_EPS)          # (NL, 1, H)
    wh = p["wh"] * s                                           # scale output columns
    bh = (p["bh"] - p["mean"]) * s + p["beta"]

    H, NC = p["wout"].shape
    NCp = max(128, ((NC + 127) // 128) * 128)
    wout = jnp.zeros((H, NCp), jnp.float32).at[:, :NC].set(p["wout"])
    bout = jnp.zeros((1, NCp), jnp.float32).at[:, :NC].set(p["bout"])

    return {
        "w0":   p["w0"].astype(jnp.bfloat16),
        "b0":   p["b0"].astype(jnp.float32),
        "wh":   wh.astype(jnp.bfloat16),
        "bh":   bh.astype(jnp.float32),
        "wout": wout.astype(jnp.bfloat16),
        "bout": bout.astype(jnp.float32),
        "nc":   NC,
    }


def init_params(key, input_dim, hidden_dim, num_classes, num_layers):
    ks = jax.random.split(key, 8)
    scale = 0.1
    return {
        "w0":    scale * jax.random.normal(ks[0], (input_dim, hidden_dim), jnp.float32),
        "b0":    scale * jax.random.normal(ks[1], (1, hidden_dim), jnp.float32),
        "wh":    scale * jax.random.normal(ks[2], (num_layers, hidden_dim, hidden_dim), jnp.float32),
        "bh":    scale * jax.random.normal(ks[3], (num_layers, 1, hidden_dim), jnp.float32),
        "gamma": 1.0 + 0.05 * jax.random.normal(ks[4], (num_layers, 1, hidden_dim), jnp.float32),
        "beta":  0.05 * jax.random.normal(ks[5], (num_layers, 1, hidden_dim), jnp.float32),
        "mean":  0.05 * jax.random.normal(ks[6], (num_layers, 1, hidden_dim), jnp.float32),
        "var":   1.0 + 0.1 * jnp.abs(jax.random.normal(ks[7], (num_layers, 1, hidden_dim), jnp.float32)),
        "wout":  scale * jax.random.normal(jax.random.fold_in(key, 99), (hidden_dim, num_classes), jnp.float32),
        "bout":  scale * jax.random.normal(jax.random.fold_in(key, 100), (1, num_classes), jnp.float32),
    }


def reference_forward(x, params):
    """Original eval-mode module math in f32 (no folding, no padding, no bf16)."""
    h = jnp.maximum(x @ params["w0"] + params["b0"], 0.0)
    for i in range(params["wh"].shape[0]):
        h = h @ params["wh"][i] + params["bh"][i]
        h = (h - params["mean"][i]) / jnp.sqrt(params["var"][i] + BN_EPS)
        h = h * params["gamma"][i] + params["beta"][i]
        h = jnp.maximum(h, 0.0)
    return h @ params["wout"] + params["bout"]


def prepared_reference(x, prep):
    """Exactly the kernel's math (bf16 operands, f32 accumulation, folded BN) in plain JAX."""
    h = jnp.dot(x.astype(jnp.bfloat16), prep["w0"], preferred_element_type=jnp.float32)
    h = jnp.maximum(h + prep["b0"], 0.0)
    for i in range(prep["wh"].shape[0]):
        h = jnp.dot(h.astype(jnp.bfloat16), prep["wh"][i],
                    preferred_element_type=jnp.float32) + prep["bh"][i]
        h = jnp.maximum(h, 0.0)
    out = jnp.dot(h.astype(jnp.bfloat16), prep["wout"],
                  preferred_element_type=jnp.float32) + prep["bout"]
    return out[:, :prep["nc"]]


if __name__ == "__main__":
    # Small shapes consistent with the module's (batch, feature) forward, but large
    # enough to exercise the 128-row batch tile and a 2-step (parallel) grid.
    batch, input_dim, hidden_dim, num_classes, num_layers = 256, 128, 128, 2, 3

    key = jax.random.PRNGKey(0)
    kx, kp = jax.random.split(key)
    x = jax.random.normal(kx, (batch, input_dim), jnp.float32)
    params = init_params(kp, input_dim, hidden_dim, num_classes, num_layers)
    prep = prepare_params(params)

    out = simple_mlp_forward(x, prep, tile_b=128)
    out = jax.block_until_ready(out)

    # Tight check: kernel plumbing vs identical-math JAX reference (same bf16/fold).
    tight = prepared_reference(x, prep)
    np.testing.assert_allclose(np.asarray(out), np.asarray(tight), rtol=1e-3, atol=1e-3)

    # Loose check: against the original f32 eval-mode module math (bf16 weight rounding).
    ref = reference_forward(x, params)
    np.testing.assert_allclose(np.asarray(out), np.asarray(ref), rtol=5e-2, atol=5e-2)

    print("KERNEL_OK")
</pallas_src>

<mosaic_0001>
module attributes {stable_mosaic.version = 11 : i64} {
  func.func @mlp_kernel(%arg0: i32, %arg1: memref<128x128xbf16, #tpu.memory_space<vmem>>, %arg2: memref<128x128xbf16, #tpu.memory_space<vmem>>, %arg3: memref<1x128xf32, #tpu.memory_space<vmem>>, %arg4: memref<3x128x128xbf16, #tpu.memory_space<vmem>>, %arg5: memref<3x1x128xf32, #tpu.memory_space<vmem>>, %arg6: memref<128x128xbf16, #tpu.memory_space<vmem>>, %arg7: memref<1x128xf32, #tpu.memory_space<vmem>>, %arg8: memref<128x128xf32, #tpu.memory_space<vmem>>) attributes {dimension_semantics = [#tpu.dimension_semantics<parallel>], iteration_bounds = array<i64: 2>, scalar_prefetch = 0 : i64, scratch_operands = 0 : i64, tpu.core_type = #tpu.core_type<tc>, window_params = [{transform_indices = @transform_0, window_bounds = array<i64: 128, 128>}, {pipeline_mode = #tpu.pipeline_mode<synchronous>, transform_indices = @transform_1, window_bounds = array<i64: 128, 128>}, {pipeline_mode = #tpu.pipeline_mode<synchronous>, transform_indices = @transform_2, window_bounds = array<i64: 1, 128>}, {pipeline_mode = #tpu.pipeline_mode<synchronous>, transform_indices = @transform_3, window_bounds = array<i64: 3, 128, 128>}, {pipeline_mode = #tpu.pipeline_mode<synchronous>, transform_indices = @transform_4, window_bounds = array<i64: 3, 1, 128>}, {pipeline_mode = #tpu.pipeline_mode<synchronous>, transform_indices = @transform_5, window_bounds = array<i64: 128, 128>}, {pipeline_mode = #tpu.pipeline_mode<synchronous>, transform_indices = @transform_6, window_bounds = array<i64: 1, 128>}, {transform_indices = @transform_7, window_bounds = array<i64: 128, 128>}]} {
    %c0 = arith.constant 0 : index
    %c0_0 = arith.constant 0 : index
    %0 = vector.load %arg1[%c0, %c0_0] : memref<128x128xbf16, #tpu.memory_space<vmem>>, vector<128x128xbf16>
    %c0_1 = arith.constant 0 : index
    %c0_2 = arith.constant 0 : index
    %1 = vector.load %arg2[%c0_1, %c0_2] : memref<128x128xbf16, #tpu.memory_space<vmem>>, vector<128x128xbf16>
    %cst = arith.constant dense<0.000000e+00> : vector<128x128xf32>
    %2 = tpu.matmul %0, %1, %cst {dimension_numbers = #tpu.dot_dimension_numbers<[1], [0], [0], [1], [0, 0, 1, 1], [], []>} : vector<128x128xbf16>, vector<128x128xbf16>, vector<128x128xf32> -> vector<128x128xf32>
    %c0_3 = arith.constant 0 : index
    %c0_4 = arith.constant 0 : index
    %3 = vector.load %arg3[%c0_3, %c0_4] : memref<1x128xf32, #tpu.memory_space<vmem>>, vector<1x128xf32>
    %4 = vector.broadcast %3 : vector<1x128xf32> to vector<128x128xf32>
    %5 = arith.addf %2, %4 : vector<128x128xf32>
    %cst_5 = arith.constant 0.000000e+00 : f32
    %6 = vector.broadcast %cst_5 : f32 to vector<128x128xf32>
    %7 = arith.maximumf %5, %6 : vector<128x128xf32>
    %8 = arith.truncf %7 : vector<128x128xf32> to vector<128x128xbf16>
    %c0_6 = arith.constant 0 : index
    %c0_7 = arith.constant 0 : index
    %c0_8 = arith.constant 0 : index
    %9 = vector.load %arg4[%c0_6, %c0_7, %c0_8] : memref<3x128x128xbf16, #tpu.memory_space<vmem>>, vector<1x128x128xbf16>
    %10 = vector.shape_cast %9 : vector<1x128x128xbf16> to vector<128x128xbf16>
    %cst_9 = arith.constant dense<0.000000e+00> : vector<128x128xf32>
    %11 = tpu.matmul %8, %10, %cst_9 {dimension_numbers = #tpu.dot_dimension_numbers<[1], [0], [0], [1], [0, 0, 1, 1], [], []>} : vector<128x128xbf16>, vector<128x128xbf16>, vector<128x128xf32> -> vector<128x128xf32>
    %c0_10 = arith.constant 0 : index
    %c0_11 = arith.constant 0 : index
    %c0_12 = arith.constant 0 : index
    %12 = vector.load %arg5[%c0_10, %c0_11, %c0_12] : memref<3x1x128xf32, #tpu.memory_space<vmem>>, vector<1x1x128xf32>
    %13 = vector.shape_cast %12 : vector<1x1x128xf32> to vector<1x128xf32>
    %14 = vector.broadcast %13 : vector<1x128xf32> to vector<128x128xf32>
    %15 = arith.addf %11, %14 : vector<128x128xf32>
    %cst_13 = arith.constant 0.000000e+00 : f32
    %16 = vector.broadcast %cst_13 : f32 to vector<128x128xf32>
    %17 = arith.maximumf %15, %16 : vector<128x128xf32>
    %18 = arith.truncf %17 : vector<128x128xf32> to vector<128x128xbf16>
    %c1 = arith.constant 1 : index
    %c0_14 = arith.constant 0 : index
    %c0_15 = arith.constant 0 : index
    %19 = vector.load %arg4[%c1, %c0_14, %c0_15] : memref<3x128x128xbf16, #tpu.memory_space<vmem>>, vector<1x128x128xbf16>
    %20 = vector.shape_cast %19 : vector<1x128x128xbf16> to vector<128x128xbf16>
    %cst_16 = arith.constant dense<0.000000e+00> : vector<128x128xf32>
    %21 = tpu.matmul %18, %20, %cst_16 {dimension_numbers = #tpu.dot_dimension_numbers<[1], [0], [0], [1], [0, 0, 1, 1], [], []>} : vector<128x128xbf16>, vector<128x128xbf16>, vector<128x128xf32> -> vector<128x128xf32>
    %c1_17 = arith.constant 1 : index
    %c0_18 = arith.constant 0 : index
    %c0_19 = arith.constant 0 : index
    %22 = vector.load %arg5[%c1_17, %c0_18, %c0_19] : memref<3x1x128xf32, #tpu.memory_space<vmem>>, vector<1x1x128xf32>
    %23 = vector.shape_cast %22 : vector<1x1x128xf32> to vector<1x128xf32>
    %24 = vector.broadcast %23 : vector<1x128xf32> to vector<128x128xf32>
    %25 = arith.addf %21, %24 : vector<128x128xf32>
    %cst_20 = arith.constant 0.000000e+00 : f32
    %26 = vector.broadcast %cst_20 : f32 to vector<128x128xf32>
    %27 = arith.maximumf %25, %26 : vector<128x128xf32>
    %28 = arith.truncf %27 : vector<128x128xf32> to vector<128x128xbf16>
    %c2 = arith.constant 2 : index
    %c0_21 = arith.constant 0 : index
    %c0_22 = arith.constant 0 : index
    %29 = vector.load %arg4[%c2, %c0_21, %c0_22] : memref<3x128x128xbf16, #tpu.memory_space<vmem>>, vector<1x128x128xbf16>
    %30 = vector.shape_cast %29 : vector<1x128x128xbf16> to vector<128x128xbf16>
    %cst_23 = arith.constant dense<0.000000e+00> : vector<128x128xf32>
    %31 = tpu.matmul %28, %30, %cst_23 {dimension_numbers = #tpu.dot_dimension_numbers<[1], [0], [0], [1], [0, 0, 1, 1], [], []>} : vector<128x128xbf16>, vector<128x128xbf16>, vector<128x128xf32> -> vector<128x128xf32>
    %c2_24 = arith.constant 2 : index
    %c0_25 = arith.constant 0 : index
    %c0_26 = arith.constant 0 : index
    %32 = vector.load %arg5[%c2_24, %c0_25, %c0_26] : memref<3x1x128xf32, #tpu.memory_space<vmem>>, vector<1x1x128xf32>
    %33 = vector.shape_cast %32 : vector<1x1x128xf32> to vector<1x128xf32>
    %34 = vector.broadcast %33 : vector<1x128xf32> to vector<128x128xf32>
    %35 = arith.addf %31, %34 : vector<128x128xf32>
    %cst_27 = arith.constant 0.000000e+00 : f32
    %36 = vector.broadcast %cst_27 : f32 to vector<128x128xf32>
    %37 = arith.maximumf %35, %36 : vector<128x128xf32>
    %38 = arith.truncf %37 : vector<128x128xf32> to vector<128x128xbf16>
    %c0_28 = arith.constant 0 : index
    %c0_29 = arith.constant 0 : index
    %39 = vector.load %arg6[%c0_28, %c0_29] : memref<128x128xbf16, #tpu.memory_space<vmem>>, vector<128x128xbf16>
    %cst_30 = arith.constant dense<0.000000e+00> : vector<128x128xf32>
    %40 = tpu.matmul %38, %39, %cst_30 {dimension_numbers = #tpu.dot_dimension_numbers<[1], [0], [0], [1], [0, 0, 1, 1], [], []>} : vector<128x128xbf16>, vector<128x128xbf16>, vector<128x128xf32> -> vector<128x128xf32>
    %c0_31 = arith.constant 0 : index
    %c0_32 = arith.constant 0 : index
    %41 = vector.load %arg7[%c0_31, %c0_32] : memref<1x128xf32, #tpu.memory_space<vmem>>, vector<1x128xf32>
    %42 = vector.broadcast %41 : vector<1x128xf32> to vector<128x128xf32>
    %43 = arith.addf %40, %42 : vector<128x128xf32>
    %c0_33 = arith.constant 0 : index
    %c0_34 = arith.constant 0 : index
    %44 = vector.load %arg8[%c0_33, %c0_34] : memref<128x128xf32, #tpu.memory_space<vmem>>, vector<128x128xf32>
    tpu.vector_store %arg8[%c0_33, %c0_34], %43 {strides = array<i32>} : memref<128x128xf32, #tpu.memory_space<vmem>>, vector<128x128xf32>,
    return
  }
  func.func @transform_0(%arg0: i32) -> (i32, i32) {
    %c0_i32 = arith.constant 0 : i32
    %c0_i32_0 = arith.constant 0 : i32
    return %arg0, %c0_i32 : i32, i32
  }
  func.func @transform_1(%arg0: i32) -> (i32, i32) {
    %c0_i32 = arith.constant 0 : i32
    %c0_i32_0 = arith.constant 0 : i32
    %c0_i32_1 = arith.constant 0 : i32
    return %c0_i32, %c0_i32_0 : i32, i32
  }
  func.func @transform_2(%arg0: i32) -> (i32, i32) {
    %c0_i32 = arith.constant 0 : i32
    %c0_i32_0 = arith.constant 0 : i32
    %c0_i32_1 = arith.constant 0 : i32
    return %c0_i32, %c0_i32_0 : i32, i32
  }
  func.func @transform_3(%arg0: i32) -> (i32, i32, i32) {
    %c0_i32 = arith.constant 0 : i32
    %c0_i32_0 = arith.constant 0 : i32
    %c0_i32_1 = arith.constant 0 : i32
    %c0_i32_2 = arith.constant 0 : i32
    return %c0_i32, %c0_i32_0, %c0_i32_1 : i32, i32, i32
  }
  func.func @transform_4(%arg0: i32) -> (i32, i32, i32) {
    %c0_i32 = arith.constant 0 : i32
    %c0_i32_0 = arith.constant 0 : i32
    %c0_i32_1 = arith.constant 0 : i32
    %c0_i32_2 = arith.constant 0 : i32
    return %c0_i32, %c0_i32_0, %c0_i32_1 : i32, i32, i32
  }
  func.func @transform_5(%arg0: i32) -> (i32, i32) {
    %c0_i32 = arith.constant 0 : i32
    %c0_i32_0 = arith.constant 0 : i32
    %c0_i32_1 = arith.constant 0 : i32
    return %c0_i32, %c0_i32_0 : i32, i32
  }
  func.func @transform_6(%arg0: i32) -> (i32, i32) {
    %c0_i32 = arith.constant 0 : i32
    %c0_i32_0 = arith.constant 0 : i32
    %c0_i32_1 = arith.constant 0 : i32
    return %c0_i32, %c0_i32_0 : i32, i32
  }
  func.func @transform_7(%arg0: i32) -> (i32, i32) {
    %c0_i32 = arith.constant 0 : i32
    %c0_i32_0 = arith.constant 0 : i32
    return %arg0, %c0_i32 : i32, i32
  }
}

</mosaic_0001>

<bundles_post_ra>
// kernel: tpu_custom_call.1
= control target key start
LH: loop header
LB: loop body
LE: loop exit
PB: predicated region body
PF: predicated region fallthrough
CT: control target
= control target key end

     0   :  { %s2188_s0 = inlined_call_operand.hbm [shape: bf16[256,128], index: 0, kind: input, shape index: {}]   ;;  %s2189_s1 = inlined_call_operand.hbm [shape: bf16[128,128], index: 1, kind: input, shape index: {}]   ;;  %s2190_s2 = inlined_call_operand.hbm [shape: f32[1,128], index: 2, kind: input, shape index: {}]   ;;  %s2191_s3 = inlined_call_operand.hbm [shape: bf16[3,128,128], index: 3, kind: input, shape index: {}]   ;;  %s2192_s4 = inlined_call_operand.vmem [shape: f32[3,1,128], index: 4, kind: input, shape index: {}]   ;;  %s2193_s5 = inlined_call_operand.hbm [shape: bf16[128,128], index: 5, kind: input, shape index: {}]   ;;  %s2194_s6 = inlined_call_operand.vmem [shape: f32[1,128], index: 6, kind: input, shape index: {}]   ;;  %s2195_s7 = inlined_call_operand.hbm [shape: f32[256,128], index: 7, kind: output, shape index: {}]  }
   0x1   :  { %2198 = sst [smem:[#allocation16_spill]] %s2189_s1 }
   0x2   :  { %12 = vsyncpa [#allocation3], 0 }
   0x3   :  { %14 = vsyncpa [#allocation3 + $0x1], 0 }
   0x4   :  { %15 = vsyncpa [#allocation6], 0 }
   0x5   :  { %16 = vsyncpa [#allocation9], 0 }
   0x6   :  { %17 = vsyncpa [#allocation4], 0 }
   0x7   :  { %19 = vsyncpa [#allocation4 + $0x1], 0  ;;  %s1917_s24 = smov 0   ;;  %s1919_s25 = smov 0  }
   0x8   :  { %s1921_s26 = smov 0   ;;  %s1923_s27 = smov 0  }
   0x9 LB: > { %s1938_s28 = sadd.s32 4294967295, %s1867_s27   ;;  %s1257_s29 = sadd.s32 4294967294, %s1867_s27   ;;  %s1867_s27 = sphi %s1923_s27, %s2212_s27   ;;  %s1863_s26 = sphi %s1921_s26, %s2211_s26   ;;  %s1859_s25 = sphi %s1919_s25, %s2210_s25   ;;  %s1855_s24 = sphi %s1917_s24, %s2209_s24  }
   0xa   : > { %p45_p0 = scmp.ne.s32.totalorder %s1859_s25, %s1855_s24  ;;  %p46_p1 = scmp.eq.s32.totalorder %s1938_s28, 0 }
   0xb   : > { %p195_p2 = scmp.eq.s32.totalorder %s1938_s28, 1  ;;  %p201_p3 = scmp.eq.s32.totalorder %s1257_s29, 1 }
   0xc   : > { %p1947_p4 = por %p46_p1, %p45_p0  ;;  %p1258_p5 = scmp.ge.s32.totalorder %s1867_s27, 1 }
   0xd   : > { %p1952_p6 = por %p201_p3, %p45_p0  ;;  %p208_p7 = scmp.lt.s32.totalorder %s1867_s27, 3 }
   0xe   : > { %s2201_s1 = sld [smem:[#allocation16_spill]]  ;;  %s1869_s13 = smov [#allocation5]  }
   0xf   : > { %p1960_p8 = pnand %p1258_p5, %p208_p7  ;;  %s221_s14 = sshll.u32 %s1869_s13, 4  ;;  %s222_s14 = int_to_ptr.vmem [resolvable:$true] %s221_s14 }
  0x10   : > { %s245_s18 = sshll.u32 %s2191_s3, 4  ;;  %s2196_s19 = smov 64   ;;  %s246_s18 = int_to_ptr.hbm [resolvable:$true] %s245_s18 }
  0x11   : > { %p1567_p9 = pneg %p1960_p8  ;;  %s2197_s20 = smov 4  }
  0x12   : > { %s1872_s21 = smov [#allocation8]   ;;  %s234_s9 = sshll.u32 %s2190_s2, 4  ;;  %s235_s9 = int_to_ptr.hbm [resolvable:$true] %s234_s9 }
  0x13   : > { %p1968_p10 = pnand %p1567_p9, %p46_p1  ;;  %s247_s22 = sshll.u32 %s1872_s21, 4  ;;  %s248_s22 = int_to_ptr.vmem [resolvable:$true] %s247_s22 }
  0x14   : > { %s219_s11 = sshll.u32 %s2201_s1, 4  ;;  %s262_s13 = sshll.u32 %s2193_s5, 4  ;;  %s220_s11 = int_to_ptr.hbm [resolvable:$true] %s219_s11  ;;  %s263_s13 = int_to_ptr.hbm [resolvable:$true] %s262_s13 }
  0x15   : > { %1570 = dma.hbm_to_vmem [thread:$0]  (!%p1968_p10), %s220_s11, 1024, %s222_s14, [#allocation6], %s2196_s19, %s2196_s19, %s2197_s20  }
  0x16   : > { %1576 = dma.hbm_to_vmem [thread:$0]  (!%p1968_p10), %s246_s18, 3072, %s248_s22, [#allocation9], %s2196_s19, %s2196_s19, %s2197_s20  }
  0x17   : > { %s1873_s14 = smov [#allocation7]   ;;  %s1874_s17 = smov [#allocation10]  }
  0x18   : > { %s236_s16 = sshll.u32 %s1873_s14, 4  ;;  %s264_s21 = sshll.u32 %s1874_s17, 4  ;;  %s237_s16 = int_to_ptr.vmem [resolvable:$true] %s236_s16  ;;  %s265_s21 = int_to_ptr.vmem [resolvable:$true] %s264_s21 }
  0x19   : > { %1573 = dma.hbm_to_vmem [thread:$0]  (!%p1968_p10), %s235_s9, 16, %s237_s16, [#allocation6]  }
  0x1a   : > { %1579 = dma.hbm_to_vmem [thread:$0]  (!%p1968_p10), %s263_s13, 1024, %s265_s21, [#allocation9], %s2196_s19, %s2196_s19, %s2197_s20  }
  0x1b   : > { %s2000_s18 = sadd.s32 1, %s1867_s27   ;;  %s32_s22 = sadd.s32 1, %s1863_s26 }
  0x1c   : > { %s29_s23 = ssub.s32 %s1867_s27, %s2000_s18  ;;  %p39_p12 = scmp.ne.s32.totalorder %s1863_s26, %s1859_s25 }
  0x1d   : > { %p30_p13 = scmp.eq.s32.totalorder %s29_s23, 0  ;;  %p40_p0 = scmp.eq.s32.totalorder %s1867_s27, 0 }
  0x1e   : > { %p2010_p3 = por %p195_p2, %p39_p12  ;;  %p1592_p5 = scmp.lt.s32.totalorder %s1867_s27, 2 }
  0x1f   : > { %s2016_s9 = scalar_select %p30_p13, %s1863_s26, %s32_s22  }
  0x20   : > { %p41_p7 = por %p40_p0, %p39_p12  ;;  %s281_s15 = sand.u32 1, %s1863_s26  }
  0x21   : > { %s1264_s10 = sshll.u32 %s281_s15, 6  ;;  %s1473_s11 = sshll.u32 %s1867_s27, 6 }
  0x22   : > { %s290_s16 = scalar_lea.hbm %s2188_s0, %s1473_s11  ;;  %s285_s17 = scalar_lea.vmem [#allocation2], %s1264_s10 }
  0x23   : > { %s293_s21 = sshll.u32 %s285_s17, 4  ;;  %s291_s23 = sshll.u32 %s290_s16, 4  ;;  %s294_s21 = int_to_ptr.vmem [resolvable:$true] %s293_s21  ;;  %s292_s23 = int_to_ptr.hbm [resolvable:$true] %s291_s23 }
  0x24   : > { %p2023_p2 = pnand %p1592_p5, %p41_p7  ;;  %s282_s22 = scalar_lea.sflag [#allocation3], %s281_s15 }
  0x25   : > { %s1763_s20 = sshra.s32 %s292_s23, 4  ;;  %s1770_s13 = scalar_lea.hbm %s2188_s0, 128  ;;  %s1764_s20 = int_to_ptr.hbm [resolvable:$true] %s1763_s20 }
  0x26   : > { %s1765_s1 = scalar_lea.hbm %s1764_s20, 64  ;;  %p1767_p10 = pneg %p2023_p2 }
  0x27   : > { %p1766_p9 = scmp.ne.s32.totalorder %s1764_s20, %s1765_s1  ;;  %p1771_p0 = scmp.lt.s32.totalorder %s1764_s20, %s2188_s0 }
  0x28   : > { %p1772_p5 = scmp.lt.s32.totalorder %s1770_s13, %s1765_s1 }
  0x29   : > { %p1768_p12 = pnand %p1767_p10, %p1766_p9 }
  0x2a   : > { %p1773_p7 = por %p1772_p5, %p1771_p0 }
  0x2b   : > { %p1769_p13 = pneg %p1768_p12 }
  0x2d   : > { %p1774_p11 = pnand %p1773_p7, %p1769_p13 }
  0x2f   : > { %1777 = shalt.err (!%p1774_p11)
}
  0x30   : > { %s2206_s15 = smov 4   ;;  %s2207_s17 = smov 64  }
  0x31   : > { %1583 = dma.hbm_to_vmem [thread:$0]  (!%p2023_p2), %s292_s23, 1024, %s294_s21, %s282_s22, %s2207_s17, %s2207_s17, %s2206_s15  }
  0x32   : > { %305 = sbr.rel (%p1960_p8) target bundleno = 916 (0x394), region = 48  ;;  %s2043_s11 = sand.u32 (!%p1960_p8), 1, %s1859_s25  }
  0x33   : > { %s1268_s20 = sshll.u32 (!%p1960_p8), %s2043_s11, 6  ;;  %s308_s1 = scalar_lea.sflag (!%p1960_p8), [#allocation3], %s2043_s11 }
  0x34   : > { %s2047_s10 = scalar_lea.vmem (!%p1960_p8), [#allocation2], %s1268_s20 }
  0x37   : > { %1838 = dma.done.wait (%p1947_p4), %s308_s1, 1024  }
  0x38   : > { %1840 = vsyncadd (%p1947_p4), %s308_s1, 4294966272 }
  0x39   : > { %1842 = dma.done.wait (%p46_p1), [#allocation6], 1040  }
  0x3a   : > { %1844 = vsyncadd (%p46_p1), [#allocation6], 4294966256 }
  0x3b   : > { %1846 = dma.done.wait (%p46_p1), [#allocation9], 4096  }
  0x3c   : > { %1848 = vsyncadd (%p46_p1), [#allocation9], 4294963200  ;;  %v1489_v0 = vld [vmem:[#allocation5 + $0x38] sm:$0xff]  ;;  %v1488_v1 = vld [vmem:[#allocation5 + $0x30] sm:$0xff]  ;;  %s1273_s13 = sshll.u32 %s2043_s11, 7  ;;  %s1522_s17 = sshll.u32 %s1938_s28, 7 }
  0x3d   : > { %497 = vmatpush.bf16.msra.mxu0 %v1489_v0  ;;  %1523 = vmatpush.bf16.msra.mxu1 %v1489_v0  ;;  %v1487_v2 = vld [vmem:[#allocation5 + $0x28] sm:$0xff]  ;;  %v1486_v3 = vld [vmem:[#allocation5 + $0x20] sm:$0xff]  ;;  %v1485_v4 = vld [vmem:[#allocation5 + $0x18] sm:$0xff]  ;;  %s2136_s15 = scalar_lea.vmem [#allocation11], %s1273_s13  ;;  %s1131_s19 = scalar_lea.sflag [#allocation4], %s2043_s11 }
  0x3e   : > { %1524 = vmatpush.bf16.msra.mxu2 %v1489_v0  ;;  %1525 = vmatpush.bf16.msra.mxu3 %v1489_v0  ;;  %v1484_v5 = vld [vmem:[#allocation5 + $0x10] sm:$0xff]  ;;  %v1483_v6 = vld [vmem:[#allocation5 + $0x8] sm:$0xff]  ;;  %v1482_v7 = vld [vmem:[#allocation5] sm:$0xff]  ;;  %s1143_s30 = sshll.u32 %s2136_s15, 4  ;;  %s1813_s13 = scalar_lea.hbm %s2195_s7, 256  ;;  %s1144_s30 = int_to_ptr.vmem [resolvable:$true] %s1143_s30 }
  0x3f   : > { %v1497_v8 = vld [vmem:[#allocation8 + $0x38] sm:$0xff]  ;;  %v1476_v10 = vld [vmem:[%s2047_s10 + $0x10] sm:$0xff]  ;;  %v1494_v15 = vld [vmem:[#allocation8 + $0x20] sm:$0xff] }
  0x40   : > { %v1474_v9 = vld [vmem:[%s2047_s10] sm:$0xff]  ;;  %v1480_v12 = vld [vmem:[%s2047_s10 + $0x30] sm:$0xff]  ;;  %v1475_v17 = vld [vmem:[%s2047_s10 + $0x8] sm:$0xff] }
  0x41   : > { %498 = vmatpush.bf16.msra.mxu0 %v1488_v1  ;;  %1526 = vmatpush.bf16.msra.mxu1 %v1488_v1  ;;  %v1478_v11 = vld [vmem:[%s2047_s10 + $0x20] sm:$0xff]  ;;  %v1496_v13 = vld [vmem:[#allocation8 + $0x30] sm:$0xff]  ;;  %v1495_v14 = vld [vmem:[#allocation8 + $0x28] sm:$0xff] }
  0x42   : > { %1527 = vmatpush.bf16.msra.mxu2 %v1488_v1  ;;  %1528 = vmatpush.bf16.msra.mxu3 %v1488_v1  ;;  %v1493_v16 = vld [vmem:[#allocation8 + $0x18] sm:$0xff]  ;;  %v1479_v19 = vld [vmem:[%s2047_s10 + $0x28] sm:$0xff]  ;;  %v1492_v21 = vld [vmem:[#allocation8 + $0x10] sm:$0xff] }
  0x43   : > { %v1477_v18 = vld [vmem:[%s2047_s10 + $0x18] sm:$0xff]  ;;  %v1491_v22 = vld [vmem:[#allocation8 + $0x8] sm:$0xff]  ;;  %v1490_v23 = vld [vmem:[#allocation8] sm:$0xff] }
  0x44   : > { %v1481_v20 = vld [vmem:[%s2047_s10 + $0x38] sm:$0xff]  ;;  %v2069_v25 = vld [vmem:[#allocation7] ss:$0 sm:$0xff]  ;;  %s1142_s10 = scalar_lea.hbm %s2195_s7, %s1522_s17 }
  0x45   : > { %499 = vmatpush.bf16.msra.mxu0 %v1487_v2  ;;  %1529 = vmatpush.bf16.msra.mxu1 %v1487_v2  ;;  %v1505_v61 = vld [vmem:[#allocation8 + $0x78] sm:$0xff]  ;;  %s1145_s12 = sshll.u32 %s1142_s10, 4  ;;  %s1146_s12 = int_to_ptr.hbm [resolvable:$true] %s1145_s12 }
  0x46   : > { %1530 = vmatpush.bf16.msra.mxu2 %v1487_v2  ;;  %1531 = vmatpush.bf16.msra.mxu3 %v1487_v2  ;;  %s1807_s21 = sshra.s32 %s1146_s12, 4  ;;  %s1808_s21 = int_to_ptr.hbm [resolvable:$true] %s1807_s21 }
  0x47   : > { %s1809_s23 = scalar_lea.hbm %s1808_s21, 128  ;;  %p1814_p11 = scmp.lt.s32.totalorder %s1808_s21, %s2195_s7 }
  0x48   : > { %p1810_p1 = scmp.ne.s32.totalorder %s1808_s21, %s1809_s23  ;;  %p1815_p2 = scmp.lt.s32.totalorder %s1813_s13, %s1809_s23 }
  0x49   : > { %500 = vmatpush.bf16.msra.mxu0 %v1486_v3  ;;  %1532 = vmatpush.bf16.msra.mxu1 %v1486_v3 }
  0x4a   : > { %1533 = vmatpush.bf16.msra.mxu2 %v1486_v3  ;;  %1534 = vmatpush.bf16.msra.mxu3 %v1486_v3  ;;  %p1811_p4 = pnand %p1810_p1, %p2010_p3  ;;  %p1816_p9 = por %p1815_p2, %p1814_p11 }
  0x4c   : > { %p1812_p8 = pneg %p1811_p4 }
  0x4d   : > { %501 = vmatpush.bf16.msra.mxu0 %v1485_v4  ;;  %1535 = vmatpush.bf16.msra.mxu1 %v1485_v4 }
  0x4e   : > { %1536 = vmatpush.bf16.msra.mxu2 %v1485_v4  ;;  %1537 = vmatpush.bf16.msra.mxu3 %v1485_v4  ;;  %p1817_p10 = pnand %p1816_p9, %p1812_p8 }
  0x51   : > { %502 = vmatpush.bf16.msra.mxu0 %v1484_v5  ;;  %1538 = vmatpush.bf16.msra.mxu1 %v1484_v5 }
  0x52   : > { %1539 = vmatpush.bf16.msra.mxu2 %v1484_v5  ;;  %1540 = vmatpush.bf16.msra.mxu3 %v1484_v5 }
  0x55   : > { %503 = vmatpush.bf16.msra.mxu0 %v1483_v6  ;;  %1541 = vmatpush.bf16.msra.mxu1 %v1483_v6 }
  0x56   : > { %1542 = vmatpush.bf16.msra.mxu2 %v1483_v6  ;;  %1543 = vmatpush.bf16.msra.mxu3 %v1483_v6  ;;  %v1504_v6 = vld [vmem:[#allocation8 + $0x70] sm:$0xff] }
  0x59   : > { %504 = vmatpush.bf16.msra.mxu0 %v1482_v7  ;;  %1544 = vmatpush.bf16.msra.mxu1 %v1482_v7 }
  0x5a   : > { %1545 = vmatpush.bf16.msra.mxu2 %v1482_v7  ;;  %1546 = vmatpush.bf16.msra.mxu3 %v1482_v7  ;;  %v1503_v7 = vld [vmem:[#allocation8 + $0x68] sm:$0xff] }
  0x5c   : > { %505 = vmatmul.bf16.vlgmr.msra.gmra.mxu0 %v1474_v9  ;;  %515 = vmatmul.bf16.vlgmr.msra.gmra.mxu1 %v1476_v10 }
  0x5d   : > { %638 = vmatpush.bf16.msrb.mxu1 %v1497_v8  ;;  %525 = vmatmul.bf16.vlgmr.msra.gmra.mxu2 %v1478_v11  ;;  %v1502_v8 = vld [vmem:[#allocation8 + $0x60] sm:$0xff] }
  0x5e   : > { %535 = vmatmul.bf16.vlgmr.msra.gmra.mxu3 %v1480_v12  ;;  %781 = vmatpush.bf16.msrb.mxu2 %v1505_v61  ;;  %v1501_v12 = vld [vmem:[#allocation8 + $0x58] sm:$0xff] }
  0x61   : > { %639 = vmatpush.bf16.msrb.mxu1 %v1496_v13 }
  0x62   : > { %782 = vmatpush.bf16.msrb.mxu2 %v1504_v6  ;;  %v1512_v6 = vld [vmem:[#allocation8 + $0xb0] sm:$0xff] }
  0x65   : > { %640 = vmatpush.bf16.msrb.mxu1 %v1495_v14 }
  0x66   : > { %783 = vmatpush.bf16.msrb.mxu2 %v1503_v7  ;;  %v1511_v7 = vld [vmem:[#allocation8 + $0xa8] sm:$0xff] }
  0x69   : > { %641 = vmatpush.bf16.msrb.mxu1 %v1494_v15 }
  0x6a   : > { %784 = vmatpush.bf16.msrb.mxu2 %v1502_v8 }
  0x6c   : > { %510 = vmatmul.bf16.gmra.mxu0 %v1475_v17  ;;  %520 = vmatmul.bf16.gmra.mxu1 %v1477_v18  ;;  %v1499_v17 = vld [vmem:[#allocation8 + $0x48] sm:$0xff] }
  0x6d   : > { %642 = vmatpush.bf16.msrb.mxu1 %v1493_v16  ;;  %530 = vmatmul.bf16.gmra.mxu2 %v1479_v19  ;;  %v1500_v16 = vld [vmem:[#allocation8 + $0x50] sm:$0xff] }
  0x6e   : > { %540 = vmatmul.bf16.gmra.mxu3 %v1481_v20  ;;  %785 = vmatpush.bf16.msrb.mxu2 %v1501_v12 }
  0x71   : > { %643 = vmatpush.bf16.msrb.mxu1 %v1492_v21  ;;  %v1498_v21 = vld [vmem:[#allocation8 + $0x40] sm:$0xff] }
  0x72   : > { %786 = vmatpush.bf16.msrb.mxu2 %v1500_v16 }
  0x75   : > { %644 = vmatpush.bf16.msrb.mxu1 %v1491_v22 }
  0x76   : > { %787 = vmatpush.bf16.msrb.mxu2 %v1499_v17  ;;  %v1508_v17 = vld [vmem:[#allocation8 + $0x90] sm:$0xff] }
  0x79   : > { %645 = vmatpush.bf16.msrb.mxu1 %v1490_v23 }
  0x7a   : > { %788 = vmatpush.bf16.msrb.mxu2 %v1498_v21 }
  0xd9   : > { %v506_v24 = vpop.f32.mrf.mxu0  ;;  %v516_v33 = vpop.f32.mrf.mxu1 }
  0xda   : > { %v507_v26 = vadd.f32 %v2069_v25, %v506_v24  ;;  %v517_v41 = vadd.f32 %v2069_v25, %v516_v33 }
  0xdc   : > { %v546_v29 = vmax.f32 %v507_v26, 0.0  ;;  %v550_v44 = vmax.f32 %v517_v41, 0.0 }
  0xe0   : > { %v526_v48 = vpop.f32.mrf.mxu2 }
  0xe1   : > { %v508_v27 = vpop.f32.mrf.mxu0  ;;  %v518_v40 = vpop.f32.mrf.mxu1  ;;  %v527_v55 = vadd.f32 %v2069_v25, %v526_v48 }
  0xe2   : > { %v509_v28 = vadd.f32 %v2069_v25, %v508_v27  ;;  %v519_v42 = vadd.f32 %v2069_v25, %v518_v40  ;;  %v536_v63 = vpop.f32.mrf.mxu3  ;;  %v2090_v27 = vld [vmem:[%s2192_s4] ss:$0 sm:$0xff] }
  0xe3   : > { %v554_v58 = vmax.f32 %v527_v55, 0.0  ;;  %v537_v9 = vadd.f32 %v2069_v25, %v536_v63 }
  0xe4   : > { %v547_v30 = vmax.f32 %v509_v28, 0.0  ;;  %v551_v45 = vmax.f32 %v519_v42, 0.0 }
  0xe5   : > { %v558_v13 = vmax.f32 %v537_v9, 0.0 }
  0xe6   : > { %v562_v31 = vpack.c.bf16 %v547_v30, %v546_v29  ;;  %v564_v46 = vpack.c.bf16 %v551_v45, %v550_v44 }
  0xe8   : > { %646 = vmatmul.bf16.vlgmr.msrb.gmra.mxu1 %v562_v31  ;;  %v528_v54 = vpop.f32.mrf.mxu2 }
  0xe9   : > { %v511_v32 = vpop.f32.mrf.mxu0  ;;  %v521_v43 = vpop.f32.mrf.mxu1  ;;  %v529_v56 = vadd.f32 %v2069_v25, %v528_v54 }
  0xea   : > { %v512_v34 = vadd.f32 %v2069_v25, %v511_v32  ;;  %v522_v49 = vadd.f32 %v2069_v25, %v521_v43  ;;  %v538_v5 = vpop.f32.mrf.mxu3 }
  0xeb   : > { %v555_v59 = vmax.f32 %v529_v56, 0.0  ;;  %v539_v10 = vadd.f32 %v2069_v25, %v538_v5 }
  0xec   : > { %v548_v37 = vmax.f32 %v512_v34, 0.0  ;;  %v552_v51 = vmax.f32 %v522_v49, 0.0 }
  0xed   : > { %v566_v60 = vpack.c.bf16 %v555_v59, %v554_v58  ;;  %v559_v14 = vmax.f32 %v539_v10, 0.0 }
  0xef   : > { %v568_v15 = vpack.c.bf16 %v559_v14, %v558_v13 }
  0xf0   : > { %v531_v57 = vpop.f32.mrf.mxu2 }
  0xf1   : > { %v513_v35 = vpop.f32.mrf.mxu0  ;;  %v523_v47 = vpop.f32.mrf.mxu1  ;;  %v532_v0 = vadd.f32 %v2069_v25, %v531_v57 }
  0xf2   : > { %v514_v36 = vadd.f32 %v2069_v25, %v513_v35  ;;  %v524_v50 = vadd.f32 %v2069_v25, %v523_v47  ;;  %v541_v11 = vpop.f32.mrf.mxu3 }
  0xf3   : > { %v556_v2 = vmax.f32 %v532_v0, 0.0  ;;  %v542_v19 = vadd.f32 %v2069_v25, %v541_v11  ;;  %v1510_v11 = vld [vmem:[#allocation8 + $0xa0] sm:$0xff] }
  0xf4   : > { %v549_v38 = vmax.f32 %v514_v36, 0.0  ;;  %v553_v52 = vmax.f32 %v524_v50, 0.0 }
  0xf5   : > { %v560_v22 = vmax.f32 %v542_v19, 0.0 }
  0xf6   : > { %v563_v39 = vpack.c.bf16 %v549_v38, %v548_v37  ;;  %v565_v53 = vpack.c.bf16 %v553_v52, %v552_v51 }
  0xf8   : > { %651 = vmatmul.bf16.gmra.mxu1 %v563_v39  ;;  %v533_v62 = vpop.f32.mrf.mxu2 }
  0xf9   : > { %v534_v1 = vadd.f32 %v2069_v25, %v533_v62 }
  0xfa   : > { %v543_v18 = vpop.f32.mrf.mxu3 }
  0xfb   : > { %v557_v3 = vmax.f32 %v534_v1, 0.0  ;;  %v544_v20 = vadd.f32 %v2069_v25, %v543_v18  ;;  %v1507_v18 = vld [vmem:[#allocation8 + $0x88] sm:$0xff] }
  0xfd   : > { %v567_v4 = vpack.c.bf16 %v557_v3, %v556_v2  ;;  %v561_v23 = vmax.f32 %v544_v20, 0.0 }
  0xff   : > { %v569_v24 = vpack.c.bf16 %v561_v23, %v560_v22 }
 0x108   : > { %656 = vmatmul.bf16.gmra.mxu1 %v564_v46 }
 0x118   : > { %661 = vmatmul.bf16.gmra.mxu1 %v565_v53 }
 0x128   : > { %666 = vmatmul.bf16.gmra.mxu1 %v566_v60 }
 0x138   : > { %671 = vmatmul.bf16.gmra.mxu1 %v567_v4  ;;  %v1513_v4 = vld [vmem:[#allocation8 + $0xb8] sm:$0xff] }
 0x139   : > { %924 = vmatpush.bf16.msrb.mxu3 %v1513_v4 }
 0x13d   : > { %925 = vmatpush.bf16.msrb.mxu3 %v1512_v6 }
 0x141   : > { %926 = vmatpush.bf16.msrb.mxu3 %v1511_v7  ;;  %v1520_v7 = vld [vmem:[#allocation10 + $0x30] sm:$0xff] }
 0x145   : > { %927 = vmatpush.bf16.msrb.mxu3 %v1510_v11 }
 0x148   : > { %676 = vmatmul.bf16.gmra.mxu1 %v568_v15  ;;  %v1509_v15 = vld [vmem:[#allocation8 + $0x98] sm:$0xff] }
 0x149   : > { %928 = vmatpush.bf16.msrb.mxu3 %v1509_v15 }
 0x14d   : > { %929 = vmatpush.bf16.msrb.mxu3 %v1508_v17 }
 0x151   : > { %930 = vmatpush.bf16.msrb.mxu3 %v1507_v18  ;;  %v1516_v18 = vld [vmem:[#allocation10 + $0x10] sm:$0xff] }
 0x158   : > { %681 = vmatmul.bf16.gmra.mxu1 %v569_v24  ;;  %v1506_v24 = vld [vmem:[#allocation8 + $0x80] sm:$0xff] }
 0x159   : > { %931 = vmatpush.bf16.msrb.mxu3 %v1506_v24 }
 0x165   : > { %v647_v26 = vpop.f32.mrf.mxu1 }
 0x166   : > { %v648_v28 = vadd.f32 %v2090_v27, %v647_v26 }
 0x168   : > { %v687_v31 = vmax.f32 %v648_v28, 0.0 }
 0x16d   : > { %v649_v29 = vpop.f32.mrf.mxu1 }
 0x16e   : > { %v650_v30 = vadd.f32 %v2090_v27, %v649_v29  ;;  %v2111_v29 = vld [vmem:[%s2192_s4 + $0x1] ss:$0 sm:$0xff] }
 0x170   : > { %v688_v32 = vmax.f32 %v650_v30, 0.0 }
 0x172   : > { %v703_v25 = vpack.c.bf16 %v688_v32, %v687_v31 }
 0x174   : > { %789 = vmatmul.bf16.vlgmr.msrb.gmra.mxu2 %v703_v25 }
 0x175   : > { %v652_v33 = vpop.f32.mrf.mxu1 }
 0x176   : > { %v653_v34 = vadd.f32 %v2090_v27, %v652_v33 }
 0x178   : > { %v689_v37 = vmax.f32 %v653_v34, 0.0 }
 0x17d   : > { %v654_v35 = vpop.f32.mrf.mxu1 }
 0x17e   : > { %v655_v36 = vadd.f32 %v2090_v27, %v654_v35 }
 0x180   : > { %v690_v38 = vmax.f32 %v655_v36, 0.0 }
 0x182   : > { %v704_v39 = vpack.c.bf16 %v690_v38, %v689_v37 }
 0x184   : > { %794 = vmatmul.bf16.gmra.mxu2 %v704_v39 }
 0x185   : > { %v657_v40 = vpop.f32.mrf.mxu1 }
 0x186   : > { %v658_v41 = vadd.f32 %v2090_v27, %v657_v40 }
 0x188   : > { %v691_v44 = vmax.f32 %v658_v41, 0.0 }
 0x18d   : > { %v659_v42 = vpop.f32.mrf.mxu1 }
 0x18e   : > { %v660_v43 = vadd.f32 %v2090_v27, %v659_v42 }
 0x190   : > { %v692_v45 = vmax.f32 %v660_v43, 0.0 }
 0x192   : > { %v705_v46 = vpack.c.bf16 %v692_v45, %v691_v44 }
 0x194   : > { %799 = vmatmul.bf16.gmra.mxu2 %v705_v46 }
 0x195   : > { %v662_v47 = vpop.f32.mrf.mxu1 }
 0x196   : > { %v663_v48 = vadd.f32 %v2090_v27, %v662_v47 }
 0x198   : > { %v693_v51 = vmax.f32 %v663_v48, 0.0 }
 0x19d   : > { %v664_v49 = vpop.f32.mrf.mxu1 }
 0x19e   : > { %v665_v50 = vadd.f32 %v2090_v27, %v664_v49 }
 0x1a0   : > { %v694_v52 = vmax.f32 %v665_v50, 0.0 }
 0x1a2   : > { %v706_v53 = vpack.c.bf16 %v694_v52, %v693_v51 }
 0x1a4   : > { %804 = vmatmul.bf16.gmra.mxu2 %v706_v53 }
 0x1a5   : > { %v667_v54 = vpop.f32.mrf.mxu1 }
 0x1a6   : > { %v668_v55 = vadd.f32 %v2090_v27, %v667_v54 }
 0x1a8   : > { %v695_v58 = vmax.f32 %v668_v55, 0.0 }
 0x1ad   : > { %v669_v56 = vpop.f32.mrf.mxu1 }
 0x1ae   : > { %v670_v57 = vadd.f32 %v2090_v27, %v669_v56 }
 0x1b0   : > { %v696_v59 = vmax.f32 %v670_v57, 0.0 }
 0x1b2   : > { %v707_v60 = vpack.c.bf16 %v696_v59, %v695_v58 }
 0x1b4   : > { %809 = vmatmul.bf16.gmra.mxu2 %v707_v60 }
 0x1b5   : > { %v672_v61 = vpop.f32.mrf.mxu1 }
 0x1b6   : > { %v673_v62 = vadd.f32 %v2090_v27, %v672_v61 }
 0x1b8   : > { %v697_v1 = vmax.f32 %v673_v62, 0.0 }
 0x1bd   : > { %v674_v63 = vpop.f32.mrf.mxu1 }
 0x1be   : > { %v675_v0 = vadd.f32 %v2090_v27, %v674_v63 }
 0x1c0   : > { %v698_v2 = vmax.f32 %v675_v0, 0.0 }
 0x1c2   : > { %v708_v3 = vpack.c.bf16 %v698_v2, %v697_v1 }
 0x1c4   : > { %814 = vmatmul.bf16.gmra.mxu2 %v708_v3 }
 0x1c5   : > { %v677_v5 = vpop.f32.mrf.mxu1 }
 0x1c6   : > { %v678_v8 = vadd.f32 %v2090_v27, %v677_v5  ;;  %v1521_v5 = vld [vmem:[#allocation10 + $0x38] sm:$0xff] }
 0x1c7   : > { %1065 = vmatpush.bf16.msrb.mxu0 %v1521_v5 }
 0x1c8   : > { %v699_v12 = vmax.f32 %v678_v8, 0.0  ;;  %v1519_v8 = vld [vmem:[#allocation10 + $0x28] sm:$0xff] }
 0x1cb   : > { %1066 = vmatpush.bf16.msrb.mxu0 %v1520_v7 }
 0x1cd   : > { %v679_v9 = vpop.f32.mrf.mxu1 }
 0x1ce   : > { %v680_v10 = vadd.f32 %v2090_v27, %v679_v9 }
 0x1cf   : > { %1067 = vmatpush.bf16.msrb.mxu0 %v1519_v8 }
 0x1d0   : > { %v700_v13 = vmax.f32 %v680_v10, 0.0 }
 0x1d2   : > { %v709_v14 = vpack.c.bf16 %v700_v13, %v699_v12  ;;  %v1518_v12 = vld [vmem:[#allocation10 + $0x20] sm:$0xff] }
 0x1d3   : > { %1068 = vmatpush.bf16.msrb.mxu0 %v1518_v12 }
 0x1d4   : > { %819 = vmatmul.bf16.gmra.mxu2 %v709_v14 }
 0x1d5   : > { %v682_v16 = vpop.f32.mrf.mxu1 }
 0x1d6   : > { %v683_v19 = vadd.f32 %v2090_v27, %v682_v16  ;;  %v1517_v16 = vld [vmem:[#allocation10 + $0x18] sm:$0xff] }
 0x1d7   : > { %1069 = vmatpush.bf16.msrb.mxu0 %v1517_v16 }
 0x1d8   : > { %v701_v22 = vmax.f32 %v683_v19, 0.0  ;;  %v1515_v19 = vld [vmem:[#allocation10 + $0x8] sm:$0xff] }
 0x1db   : > { %1070 = vmatpush.bf16.msrb.mxu0 %v1516_v18 }
 0x1dd   : > { %v684_v20 = vpop.f32.mrf.mxu1 }
 0x1de   : > { %v685_v21 = vadd.f32 %v2090_v27, %v684_v20 }
 0x1df   : > { %1071 = vmatpush.bf16.msrb.mxu0 %v1515_v19 }
 0x1e0   : > { %v702_v23 = vmax.f32 %v685_v21, 0.0 }
 0x1e2   : > { %v710_v26 = vpack.c.bf16 %v702_v23, %v701_v22 }
 0x1e4   : > { %824 = vmatmul.bf16.gmra.mxu2 %v710_v26  ;;  %v1514_v26 = vld [vmem:[#allocation10] sm:$0xff] }
 0x1e5   : > { %1072 = vmatpush.bf16.msrb.mxu0 %v1514_v26 }
 0x1f7   : > { %v790_v28 = vpop.f32.mrf.mxu2 }
 0x1f8   : > { %v791_v30 = vadd.f32 %v2111_v29, %v790_v28 }
 0x1fa   : > { %v830_v25 = vmax.f32 %v791_v30, 0.0 }
 0x1ff   : > { %v792_v31 = vpop.f32.mrf.mxu2 }
 0x200   : > { %v793_v32 = vadd.f32 %v2111_v29, %v792_v31  ;;  %v1641_v31 = vld [vmem:[%s2192_s4 + $0x2] ss:$0 sm:$0xff] }
 0x202   : > { %v831_v27 = vmax.f32 %v793_v32, 0.0 }
 0x204   : > { %v846_v33 = vpack.c.bf16 %v831_v27, %v830_v25 }
 0x206   : > { %932 = vmatmul.bf16.vlgmr.msrb.gmra.mxu3 %v846_v33 }
 0x207   : > { %v795_v34 = vpop.f32.mrf.mxu2 }
 0x208   : > { %v796_v35 = vadd.f32 %v2111_v29, %v795_v34 }
 0x20a   : > { %v832_v38 = vmax.f32 %v796_v35, 0.0 }
 0x20f   : > { %v797_v36 = vpop.f32.mrf.mxu2 }
 0x210   : > { %v798_v37 = vadd.f32 %v2111_v29, %v797_v36 }
 0x212   : > { %v833_v39 = vmax.f32 %v798_v37, 0.0 }
 0x214   : > { %v847_v40 = vpack.c.bf16 %v833_v39, %v832_v38 }
 0x216   : > { %937 = vmatmul.bf16.gmra.mxu3 %v847_v40 }
 0x217   : > { %v800_v41 = vpop.f32.mrf.mxu2 }
 0x218   : > { %v801_v42 = vadd.f32 %v2111_v29, %v800_v41 }
 0x21a   : > { %v834_v45 = vmax.f32 %v801_v42, 0.0 }
 0x21f   : > { %v802_v43 = vpop.f32.mrf.mxu2 }
 0x220   : > { %v803_v44 = vadd.f32 %v2111_v29, %v802_v43 }
 0x222   : > { %v835_v46 = vmax.f32 %v803_v44, 0.0 }
 0x224   : > { %v848_v47 = vpack.c.bf16 %v835_v46, %v834_v45 }
 0x226   : > { %942 = vmatmul.bf16.gmra.mxu3 %v848_v47 }
 0x227   : > { %v805_v48 = vpop.f32.mrf.mxu2 }
 0x228   : > { %v806_v49 = vadd.f32 %v2111_v29, %v805_v48 }
 0x22a   : > { %v836_v52 = vmax.f32 %v806_v49, 0.0 }
 0x22f   : > { %v807_v50 = vpop.f32.mrf.mxu2 }
 0x230   : > { %v808_v51 = vadd.f32 %v2111_v29, %v807_v50 }
 0x232   : > { %v837_v53 = vmax.f32 %v808_v51, 0.0 }
 0x234   : > { %v849_v54 = vpack.c.bf16 %v837_v53, %v836_v52 }
 0x236   : > { %947 = vmatmul.bf16.gmra.mxu3 %v849_v54 }
 0x237   : > { %v810_v55 = vpop.f32.mrf.mxu2 }
 0x238   : > { %v811_v56 = vadd.f32 %v2111_v29, %v810_v55 }
 0x23a   : > { %v838_v59 = vmax.f32 %v811_v56, 0.0 }
 0x23f   : > { %v812_v57 = vpop.f32.mrf.mxu2 }
 0x240   : > { %v813_v58 = vadd.f32 %v2111_v29, %v812_v57 }
 0x242   : > { %v839_v60 = vmax.f32 %v813_v58, 0.0 }
 0x244   : > { %v850_v61 = vpack.c.bf16 %v839_v60, %v838_v59 }
 0x246   : > { %952 = vmatmul.bf16.gmra.mxu3 %v850_v61 }
 0x247   : > { %v815_v62 = vpop.f32.mrf.mxu2 }
 0x248   : > { %v816_v63 = vadd.f32 %v2111_v29, %v815_v62 }
 0x24a   : > { %v840_v2 = vmax.f32 %v816_v63, 0.0 }
 0x24f   : > { %v817_v0 = vpop.f32.mrf.mxu2 }
 0x250   : > { %v818_v1 = vadd.f32 %v2111_v29, %v817_v0 }
 0x252   : > { %v841_v3 = vmax.f32 %v818_v1, 0.0 }
 0x254   : > { %v851_v4 = vpack.c.bf16 %v841_v3, %v840_v2 }
 0x256   : > { %957 = vmatmul.bf16.gmra.mxu3 %v851_v4 }
 0x257   : > { %v820_v6 = vpop.f32.mrf.mxu2 }
 0x258   : > { %v821_v9 = vadd.f32 %v2111_v29, %v820_v6 }
 0x25a   : > { %v842_v13 = vmax.f32 %v821_v9, 0.0 }
 0x25f   : > { %v822_v10 = vpop.f32.mrf.mxu2 }
 0x260   : > { %v823_v11 = vadd.f32 %v2111_v29, %v822_v10 }
 0x262   : > { %v843_v14 = vmax.f32 %v823_v11, 0.0 }
 0x264   : > { %v852_v15 = vpack.c.bf16 %v843_v14, %v842_v13 }
 0x266   : > { %962 = vmatmul.bf16.gmra.mxu3 %v852_v15 }
 0x267   : > { %v825_v17 = vpop.f32.mrf.mxu2 }
 0x268   : > { %v826_v20 = vadd.f32 %v2111_v29, %v825_v17 }
 0x26a   : > { %v844_v23 = vmax.f32 %v826_v20, 0.0  ;;  %v1642_v20 = vld [vmem:[%s2194_s6] ss:$0 sm:$0xff] }
 0x26f   : > { %v827_v21 = vpop.f32.mrf.mxu2 }
 0x270   : > { %v828_v22 = vadd.f32 %v2111_v29, %v827_v21 }
 0x272   : > { %v845_v24 = vmax.f32 %v828_v22, 0.0 }
 0x274   : > { %v853_v28 = vpack.c.bf16 %v845_v24, %v844_v23 }
 0x276   : > { %967 = vmatmul.bf16.gmra.mxu3 %v853_v28 }
 0x289   : > { %v933_v30 = vpop.f32.mrf.mxu3 }
 0x28a   : > { %v934_v32 = vadd.f32 %v1641_v31, %v933_v30 }
 0x28c   : > { %v973_v33 = vmax.f32 %v934_v32, 0.0 }
 0x291   : > { %v935_v25 = vpop.f32.mrf.mxu3 }
 0x292   : > { %v936_v27 = vadd.f32 %v1641_v31, %v935_v25 }
 0x294   : > { %v974_v34 = vmax.f32 %v936_v27, 0.0 }
 0x296   : > { %v989_v35 = vpack.c.bf16 %v974_v34, %v973_v33 }
 0x298   : > { %1073 = vmatmul.bf16.vlgmr.msrb.gmra.mxu0 %v989_v35 }
 0x299   : > { %v938_v29 = vpop.f32.mrf.mxu3 }
 0x29a   : > { %v939_v36 = vadd.f32 %v1641_v31, %v938_v29 }
 0x29c   : > { %v975_v39 = vmax.f32 %v939_v36, 0.0 }
 0x2a1   : > { %v940_v37 = vpop.f32.mrf.mxu3 }
 0x2a2   : > { %v941_v38 = vadd.f32 %v1641_v31, %v940_v37 }
 0x2a4   : > { %v976_v40 = vmax.f32 %v941_v38, 0.0 }
 0x2a6   : > { %v990_v41 = vpack.c.bf16 %v976_v40, %v975_v39 }
 0x2a8   : > { %1078 = vmatmul.bf16.gmra.mxu0 %v990_v41 }
 0x2a9   : > { %v943_v42 = vpop.f32.mrf.mxu3 }
 0x2aa   : > { %v944_v43 = vadd.f32 %v1641_v31, %v943_v42 }
 0x2ac   : > { %v977_v46 = vmax.f32 %v944_v43, 0.0 }
 0x2b1   : > { %v945_v44 = vpop.f32.mrf.mxu3 }
 0x2b2   : > { %v946_v45 = vadd.f32 %v1641_v31, %v945_v44 }
 0x2b4   : > { %v978_v47 = vmax.f32 %v946_v45, 0.0 }
 0x2b6   : > { %v991_v48 = vpack.c.bf16 %v978_v47, %v977_v46 }
 0x2b8   : > { %1083 = vmatmul.bf16.gmra.mxu0 %v991_v48 }
 0x2b9   : > { %v948_v49 = vpop.f32.mrf.mxu3 }
 0x2ba   : > { %v949_v50 = vadd.f32 %v1641_v31, %v948_v49 }
 0x2bc   : > { %v979_v53 = vmax.f32 %v949_v50, 0.0 }
 0x2c1   : > { %v950_v51 = vpop.f32.mrf.mxu3 }
 0x2c2   : > { %v951_v52 = vadd.f32 %v1641_v31, %v950_v51 }
 0x2c4   : > { %v980_v54 = vmax.f32 %v951_v52, 0.0 }
 0x2c6   : > { %v992_v55 = vpack.c.bf16 %v980_v54, %v979_v53 }
 0x2c8   : > { %1088 = vmatmul.bf16.gmra.mxu0 %v992_v55 }
 0x2c9   : > { %v953_v56 = vpop.f32.mrf.mxu3 }
 0x2ca   : > { %v954_v57 = vadd.f32 %v1641_v31, %v953_v56 }
 0x2cc   : > { %v981_v60 = vmax.f32 %v954_v57, 0.0 }
 0x2d1   : > { %v955_v58 = vpop.f32.mrf.mxu3 }
 0x2d2   : > { %v956_v59 = vadd.f32 %v1641_v31, %v955_v58 }
 0x2d4   : > { %v982_v61 = vmax.f32 %v956_v59, 0.0 }
 0x2d6   : > { %v993_v62 = vpack.c.bf16 %v982_v61, %v981_v60 }
 0x2d8   : > { %1093 = vmatmul.bf16.gmra.mxu0 %v993_v62 }
 0x2d9   : > { %v958_v63 = vpop.f32.mrf.mxu3 }
 0x2da   : > { %v959_v0 = vadd.f32 %v1641_v31, %v958_v63 }
 0x2dc   : > { %v983_v3 = vmax.f32 %v959_v0, 0.0 }
 0x2e1   : > { %v960_v1 = vpop.f32.mrf.mxu3 }
 0x2e2   : > { %v961_v2 = vadd.f32 %v1641_v31, %v960_v1 }
 0x2e4   : > { %v984_v4 = vmax.f32 %v961_v2, 0.0 }
 0x2e6   : > { %v994_v5 = vpack.c.bf16 %v984_v4, %v983_v3 }
 0x2e8   : > { %1098 = vmatmul.bf16.gmra.mxu0 %v994_v5 }
 0x2e9   : > { %v963_v6 = vpop.f32.mrf.mxu3 }
 0x2ea   : > { %v964_v7 = vadd.f32 %v1641_v31, %v963_v6 }
 0x2ec   : > { %v985_v10 = vmax.f32 %v964_v7, 0.0 }
 0x2f1   : > { %v965_v8 = vpop.f32.mrf.mxu3 }
 0x2f2   : > { %v966_v9 = vadd.f32 %v1641_v31, %v965_v8 }
 0x2f4   : > { %v986_v11 = vmax.f32 %v966_v9, 0.0 }
 0x2f6   : > { %v995_v12 = vpack.c.bf16 %v986_v11, %v985_v10 }
 0x2f8   : > { %1103 = vmatmul.bf16.gmra.mxu0 %v995_v12 }
 0x2f9   : > { %v968_v13 = vpop.f32.mrf.mxu3 }
 0x2fa   : > { %v969_v14 = vadd.f32 %v1641_v31, %v968_v13 }
 0x2fc   : > { %v987_v17 = vmax.f32 %v969_v14, 0.0 }
 0x301   : > { %v970_v15 = vpop.f32.mrf.mxu3 }
 0x302   : > { %v971_v16 = vadd.f32 %v1641_v31, %v970_v15 }
 0x304   : > { %v988_v18 = vmax.f32 %v971_v16, 0.0 }
 0x306   : > { %v996_v19 = vpack.c.bf16 %v988_v18, %v987_v17 }
 0x308   : > { %1108 = vmatmul.bf16.gmra.mxu0 %v996_v19 }
 0x315   : > { %v1074_v21 = vpop.f32.mrf.mxu0 }
 0x316   : > { %v1075_v22 = vadd.f32 %v1642_v20, %v1074_v21 }
 0x318   : > { %1114 = vst [vmem:[%s2136_s15] sm:$0xff] %v1075_v22 }
 0x31d   : > { %v1076_v23 = vpop.f32.mrf.mxu0 }
 0x31e   : > { %v1077_v24 = vadd.f32 %v1642_v20, %v1076_v23 }
 0x320   : > { %1115 = vst [vmem:[%s2136_s15 + $0x8] sm:$0xff] %v1077_v24 }
 0x325   : > { %v1079_v26 = vpop.f32.mrf.mxu0 }
 0x326   : > { %v1080_v28 = vadd.f32 %v1642_v20, %v1079_v26 }
 0x328   : > { %1116 = vst [vmem:[%s2136_s15 + $0x10] sm:$0xff] %v1080_v28 }
 0x32d   : > { %v1081_v30 = vpop.f32.mrf.mxu0 }
 0x32e   : > { %v1082_v31 = vadd.f32 %v1642_v20, %v1081_v30 }
 0x330   : > { %1117 = vst [vmem:[%s2136_s15 + $0x18] sm:$0xff] %v1082_v31 }
 0x335   : > { %v1084_v32 = vpop.f32.mrf.mxu0 }
 0x336   : > { %v1085_v25 = vadd.f32 %v1642_v20, %v1084_v32 }
 0x338   : > { %1118 = vst [vmem:[%s2136_s15 + $0x20] sm:$0xff] %v1085_v25 }
 0x33d   : > { %v1086_v27 = vpop.f32.mrf.mxu0 }
 0x33e   : > { %v1087_v33 = vadd.f32 %v1642_v20, %v1086_v27 }
 0x340   : > { %1119 = vst [vmem:[%s2136_s15 + $0x28] sm:$0xff] %v1087_v33 }
 0x345   : > { %v1089_v34 = vpop.f32.mrf.mxu0 }
 0x346   : > { %v1090_v35 = vadd.f32 %v1642_v20, %v1089_v34 }
 0x348   : > { %1120 = vst [vmem:[%s2136_s15 + $0x30] sm:$0xff] %v1090_v35 }
 0x34d   : > { %v1091_v29 = vpop.f32.mrf.mxu0 }
 0x34e   : > { %v1092_v36 = vadd.f32 %v1642_v20, %v1091_v29 }
 0x350   : > { %1121 = vst [vmem:[%s2136_s15 + $0x38] sm:$0xff] %v1092_v36 }
 0x355   : > { %v1094_v37 = vpop.f32.mrf.mxu0 }
 0x356   : > { %v1095_v38 = vadd.f32 %v1642_v20, %v1094_v37 }
 0x358   : > { %1122 = vst [vmem:[%s2136_s15 + $0x40] sm:$0xff] %v1095_v38 }
 0x35d   : > { %v1096_v39 = vpop.f32.mrf.mxu0 }
 0x35e   : > { %v1097_v40 = vadd.f32 %v1642_v20, %v1096_v39 }
 0x360   : > { %1123 = vst [vmem:[%s2136_s15 + $0x48] sm:$0xff] %v1097_v40 }
 0x365   : > { %v1099_v41 = vpop.f32.mrf.mxu0 }
 0x366   : > { %v1100_v42 = vadd.f32 %v1642_v20, %v1099_v41 }
 0x368   : > { %1124 = vst [vmem:[%s2136_s15 + $0x50] sm:$0xff] %v1100_v42 }
 0x36d   : > { %v1101_v43 = vpop.f32.mrf.mxu0 }
 0x36e   : > { %v1102_v44 = vadd.f32 %v1642_v20, %v1101_v43 }
 0x370   : > { %1125 = vst [vmem:[%s2136_s15 + $0x58] sm:$0xff] %v1102_v44 }
 0x375   : > { %v1104_v45 = vpop.f32.mrf.mxu0 }
 0x376   : > { %v1105_v46 = vadd.f32 %v1642_v20, %v1104_v45 }
 0x378   : > { %1126 = vst [vmem:[%s2136_s15 + $0x60] sm:$0xff] %v1105_v46 }
 0x37d   : > { %v1106_v47 = vpop.f32.mrf.mxu0 }
 0x37e   : > { %v1107_v48 = vadd.f32 %v1642_v20, %v1106_v47 }
 0x380   : > { %1127 = vst [vmem:[%s2136_s15 + $0x68] sm:$0xff] %v1107_v48 }
 0x385   : > { %v1109_v49 = vpop.f32.mrf.mxu0 }
 0x386   : > { %v1110_v50 = vadd.f32 %v1642_v20, %v1109_v49 }
 0x388   : > { %1128 = vst [vmem:[%s2136_s15 + $0x70] sm:$0xff] %v1110_v50 }
 0x38d   : > { %v1111_v51 = vpop.f32.mrf.mxu0 }
 0x38e   : > { %v1112_v52 = vadd.f32 %v1642_v20, %v1111_v51 }
 0x390   : > { %1129 = vst [vmem:[%s2136_s15 + $0x78] sm:$0xff] %v1112_v52 }
 0x391   : > { %1820 = shalt.err (!%p1817_p10)
}
 0x392   : > { %s1875_s11 = smov 128   ;;  %s1876_s15 = smov 8  }
 0x393   : > { %1565 = dma.vmem_to_hbm [thread:$0]  (%p2010_p3), %s1144_s30, 2048, %s1146_s12, %s1131_s19, %s1875_s11, %s1875_s11, %s1876_s15  }
 0x394 PF: > { %s1160_s17 = sand.u32 1, %s1855_s24   ;;  %p2208_p12 = scmp.ge.s32.totalorder %s1867_s27, 2 }
 0x395   : > { %s1161_s20 = scalar_lea.sflag [#allocation4], %s1160_s17 }
 0x396   : > { %p1585_p13 = pnand %p2208_p12, %p1952_p6 }
 0x398   : > { %p1586_p0 = pneg %p1585_p13 }
 0x39a   : > { %1850 = dma.done.wait (%p1586_p0), %s1161_s20, 2048  }
 0x39b   : > { %1852 = vsyncadd (%p1586_p0), %s1161_s20, 4294965248  ;;  %p22_p5 = scmp.ge.s32.totalorder %s2000_s18, 4   ;;  %s2209_s24 = smov %s1859_s25 }
 0x39c   : > { %s2210_s25 = smov %s1863_s26  ;;  %s2211_s26 = smov %s2016_s9 }
 0x39d   : > { %s2212_s27 = smov %s2000_s18  ;;  %24 = sbr.rel (!%p22_p5) target bundleno = 9 (0x9), region = 113 }
 0x3a2   :  { %1167 = vsyncpa [#allocation3], 1 }
 0x3a3   :  { %1169 = vsyncpa [#allocation3 + $0x1], 1 }
 0x3a4   :  { %1170 = vsyncpa [#allocation6], 1 }
 0x3a5   :  { %1171 = vsyncpa [#allocation9], 1 }
 0x3a6   :  { %1172 = vsyncpa [#allocation4], 1 }
 0x3a7   :  { %1174 = vsyncpa [#allocation4 + $0x1], 1 }

</bundles_post_ra>
